<compile_context>
chip_gen: v6e
topology: v6e:2x2x1
jax: 0.10.0
libtpu: 0.0.40
codegen_flags: <defaults>
</compile_context>

<pallas_src>
import jax
import jax.numpy as jnp
from jax.experimental import pallas as pl
from jax.experimental.pallas import tpu as pltpu

INPUT_SIZE = 12
HIDDEN_SIZE = 12
BN_EPS = 1e-5
LANE = 128
DEFAULT_TILE_B = 1024  # batch elements per grid step (lane-dense: tiny in VMEM)


def _round_up(n, m):
    return ((n + m - 1) // m) * m


def synthetic_kernel(x_ref, w1_ref, b1_ref, w2_ref, b2_ref, o_ref):
    # x_ref:  (12, TILE_B) bf16   -- features on sublanes, batch on lanes
    # w1_ref: (12, 12) f32        -- BN already folded in (out x in)
    # b1_ref: (12, 1)  f32        -- folded bias, broadcasts over lanes
    # w2_ref: (1, 12)  f32
    # b2_ref: (1, 1)   f32
    # o_ref:  (1, TILE_B) f32     -- lane-dense output tile
    x = x_ref[...].astype(jnp.float32)  # cast up right after load (v5e-safe)

    # Linear(12->12) + folded BatchNorm1d (eval / running stats)
    h = jnp.dot(w1_ref[...], x, preferred_element_type=jnp.float32) + b1_ref[...]

    # ReLU (Dropout == identity in eval mode)
    h = jnp.maximum(h, 0.0)

    # Linear(12->1)
    y = jnp.dot(w2_ref[...], h, preferred_element_type=jnp.float32) + b2_ref[...]

    # Sigmoid
    o_ref[...] = jax.nn.sigmoid(y)


def synthetic_forward(x, params, tile_b=DEFAULT_TILE_B):
    """x: (B, 1, 12) float32 -> (B, 1) float32 (eval-mode forward)."""
    x2d = jnp.squeeze(x, axis=1)  # torch: x.squeeze(1)
    B = x2d.shape[0]

    # ---- Fold eval-mode BN into Linear1 (trace-time, outside the kernel) ----
    scale = params["gamma"] * jax.lax.rsqrt(params["running_var"] + BN_EPS)  # (12,)
    w1_fold = params["w1"] * scale[:, None]                                   # (12, 12) out x in
    b1_fold = ((params["b1"] - params["running_mean"]) * scale
               + params["beta"])[:, None]                                     # (12, 1)
    w2 = params["w2"]                                                         # (1, 12)
    b2 = params["b2"][:, None]                                                # (1, 1)

    # ---- Lane-dense layout: transpose so batch sits on lanes, pad to tile ----
    tile_b = min(tile_b, _round_up(B, LANE))
    b_pad = _round_up(B, tile_b)
    xT = jnp.transpose(x2d).astype(jnp.bfloat16)                              # (12, B)
    if b_pad != B:
        xT = jnp.pad(xT, ((0, 0), (0, b_pad - B)))

    grid = (b_pad // tile_b,)

    cost = pl.CostEstimate(
        flops=2 * b_pad * HIDDEN_SIZE * (INPUT_SIZE + 1),
        transcendentals=b_pad,  # sigmoid exp
        bytes_accessed=b_pad * INPUT_SIZE * 2 + b_pad * 4
        + 4 * (HIDDEN_SIZE * INPUT_SIZE + HIDDEN_SIZE + HIDDEN_SIZE + 1),
    )

    out = pl.pallas_call(
        synthetic_kernel,
        out_shape=jax.ShapeDtypeStruct((1, b_pad), jnp.float32),
        grid=grid,
        in_specs=[
            pl.BlockSpec((INPUT_SIZE, tile_b), lambda i: (0, i)),       # xT tile
            pl.BlockSpec((HIDDEN_SIZE, INPUT_SIZE), lambda i: (0, 0)),  # w1 (resident)
            pl.BlockSpec((HIDDEN_SIZE, 1), lambda i: (0, 0)),           # b1 (resident)
            pl.BlockSpec((1, HIDDEN_SIZE), lambda i: (0, 0)),           # w2 (resident)
            pl.BlockSpec((1, 1), lambda i: (0, 0)),                     # b2 (resident)
        ],
        out_specs=pl.BlockSpec((1, tile_b), lambda i: (0, i)),
        compiler_params=pltpu.CompilerParams(
            dimension_semantics=("parallel",),
        ),
        cost_estimate=cost,
    )(xT, w1_fold, b1_fold, w2, b2)

    # (1, b_pad) -> (B, 1)
    return out[0, :B][:, None]


def init_params(key):
    """Deterministic init mirroring the PyTorch module's _initialize_weights."""
    k1, k2 = jax.random.split(key, 2)

    # kaiming_normal_(nonlinearity='relu'): std = sqrt(2 / fan_in)
    std1 = (2.0 / INPUT_SIZE) ** 0.5
    std2 = (2.0 / HIDDEN_SIZE) ** 0.5

    # PyTorch Linear weight layout: (out_features, in_features)
    w1 = jax.random.normal(k1, (HIDDEN_SIZE, INPUT_SIZE), jnp.float32) * std1
    w2 = jax.random.normal(k2, (1, HIDDEN_SIZE), jnp.float32) * std2

    return {
        "w1": w1,                                            # (12, 12)
        "b1": jnp.zeros((HIDDEN_SIZE,), jnp.float32),        # (12,)
        "gamma": jnp.ones((HIDDEN_SIZE,), jnp.float32),      # BN weight
        "beta": jnp.zeros((HIDDEN_SIZE,), jnp.float32),      # BN bias
        "running_mean": jnp.zeros((HIDDEN_SIZE,), jnp.float32),
        "running_var": jnp.ones((HIDDEN_SIZE,), jnp.float32),
        "w2": w2,                                            # (1, 12)
        "b2": jnp.zeros((1,), jnp.float32),
    }


if __name__ == "__main__":
    key = jax.random.PRNGKey(0)
    kx, kp = jax.random.split(key)

    B = 8
    x = jax.random.normal(kx, (B, 1, INPUT_SIZE), jnp.float32)
    params = init_params(kp)

    out = jax.block_until_ready(synthetic_forward(x, params))

    # Pure-JAX reference (same bf16 rounding of the input transfer).
    x2d = jnp.squeeze(x, axis=1)
    xq = x2d.astype(jnp.bfloat16).astype(jnp.float32)
    h = xq @ params["w1"].T + params["b1"]
    h = (h - params["running_mean"]) * jax.lax.rsqrt(params["running_var"] + BN_EPS) \
        * params["gamma"] + params["beta"]
    h = jnp.maximum(h, 0.0)
    ref = jax.nn.sigmoid(h @ params["w2"].T + params["b2"])  # (B, 1)

    assert out.shape == (B, 1)
    assert jnp.allclose(out, ref, atol=1e-4, rtol=1e-4)

    print("KERNEL_OK")
</pallas_src>

<mosaic_0001>
module attributes {stable_mosaic.version = 11 : i64} {
  func.func @synthetic_kernel(%arg0: i32, %arg1: memref<12x128xbf16, #tpu.memory_space<vmem>>, %arg2: memref<12x12xf32, #tpu.memory_space<vmem>>, %arg3: memref<12x1xf32, #tpu.memory_space<vmem>>, %arg4: memref<1x12xf32, #tpu.memory_space<vmem>>, %arg5: memref<1x1xf32, #tpu.memory_space<vmem>>, %arg6: memref<1x128xf32, #tpu.memory_space<vmem>>) attributes {dimension_semantics = [#tpu.dimension_semantics<parallel>], iteration_bounds = array<i64: 1>, scalar_prefetch = 0 : i64, scratch_operands = 0 : i64, tpu.core_type = #tpu.core_type<tc>, window_params = [{transform_indices = @transform_0, window_bounds = array<i64: 12, 128>}, {pipeline_mode = #tpu.pipeline_mode<synchronous>, transform_indices = @transform_1, window_bounds = array<i64: 12, 12>}, {pipeline_mode = #tpu.pipeline_mode<synchronous>, transform_indices = @transform_2, window_bounds = array<i64: 12, 1>}, {pipeline_mode = #tpu.pipeline_mode<synchronous>, transform_indices = @transform_3, window_bounds = array<i64: 1, 12>}, {pipeline_mode = #tpu.pipeline_mode<synchronous>, transform_indices = @transform_4, window_bounds = array<i64: 1, 1>}, {transform_indices = @transform_5, window_bounds = array<i64: 1, 128>}]} {
    %c0 = arith.constant 0 : index
    %c0_0 = arith.constant 0 : index
    %0 = vector.load %arg1[%c0, %c0_0] : memref<12x128xbf16, #tpu.memory_space<vmem>>, vector<12x128xbf16>
    %1 = arith.extf %0 : vector<12x128xbf16> to vector<12x128xf32>
    %c0_1 = arith.constant 0 : index
    %c0_2 = arith.constant 0 : index
    %2 = vector.load %arg2[%c0_1, %c0_2] : memref<12x12xf32, #tpu.memory_space<vmem>>, vector<12x12xf32>
    %cst = arith.constant dense<0.000000e+00> : vector<12x128xf32>
    %3 = tpu.matmul %2, %1, %cst {dimension_numbers = #tpu.dot_dimension_numbers<[1], [0], [0], [1], [0, 0, 1, 1], [], []>} : vector<12x12xf32>, vector<12x128xf32>, vector<12x128xf32> -> vector<12x128xf32>
    %c0_3 = arith.constant 0 : index
    %c0_4 = arith.constant 0 : index
    %4 = vector.load %arg3[%c0_3, %c0_4] : memref<12x1xf32, #tpu.memory_space<vmem>>, vector<12x1xf32>
    %5 = vector.broadcast %4 : vector<12x1xf32> to vector<12x128xf32>
    %6 = arith.addf %3, %5 : vector<12x128xf32>
    %cst_5 = arith.constant 0.000000e+00 : f32
    %7 = vector.broadcast %cst_5 : f32 to vector<12x128xf32>
    %8 = arith.maximumf %6, %7 : vector<12x128xf32>
    %c0_6 = arith.constant 0 : index
    %c0_7 = arith.constant 0 : index
    %9 = vector.load %arg4[%c0_6, %c0_7] : memref<1x12xf32, #tpu.memory_space<vmem>>, vector<1x12xf32>
    %cst_8 = arith.constant dense<0.000000e+00> : vector<1x128xf32>
    %10 = tpu.matmul %9, %8, %cst_8 {dimension_numbers = #tpu.dot_dimension_numbers<[1], [0], [0], [1], [0, 0, 1, 1], [], []>} : vector<1x12xf32>, vector<12x128xf32>, vector<1x128xf32> -> vector<1x128xf32>
    %c0_9 = arith.constant 0 : index
    %c0_10 = arith.constant 0 : index
    %11 = vector.load %arg5[%c0_9, %c0_10] : memref<1x1xf32, #tpu.memory_space<vmem>>, vector<1x1xf32>
    %12 = vector.broadcast %11 : vector<1x1xf32> to vector<1x128xf32>
    %13 = arith.addf %10, %12 : vector<1x128xf32>
    %14 = arith.negf %13 : vector<1x128xf32>
    %15 = math.exp %14 : vector<1x128xf32>
    %cst_11 = arith.constant 1.000000e+00 : f32
    %16 = vector.broadcast %cst_11 : f32 to vector<1x128xf32>
    %17 = arith.addf %16, %15 : vector<1x128xf32>
    %18 = arith.divf %16, %17 : vector<1x128xf32>
    %c0_12 = arith.constant 0 : index
    %c0_13 = arith.constant 0 : index
    %19 = vector.load %arg6[%c0_12, %c0_13] : memref<1x128xf32, #tpu.memory_space<vmem>>, vector<1x128xf32>
    tpu.vector_store %arg6[%c0_12, %c0_13], %18 {strides = array<i32>} : memref<1x128xf32, #tpu.memory_space<vmem>>, vector<1x128xf32>,
    return
  }
  func.func @transform_0(%arg0: i32) -> (i32, i32) {
    %c0_i32 = arith.constant 0 : i32
    %c0_i32_0 = arith.constant 0 : i32
    return %c0_i32, %arg0 : i32, i32
  }
  func.func @transform_1(%arg0: i32) -> (i32, i32) {
    %c0_i32 = arith.constant 0 : i32
    %c0_i32_0 = arith.constant 0 : i32
    %c0_i32_1 = arith.constant 0 : i32
    return %c0_i32, %c0_i32_0 : i32, i32
  }
  func.func @transform_2(%arg0: i32) -> (i32, i32) {
    %c0_i32 = arith.constant 0 : i32
    %c0_i32_0 = arith.constant 0 : i32
    %c0_i32_1 = arith.constant 0 : i32
    return %c0_i32, %c0_i32_0 : i32, i32
  }
  func.func @transform_3(%arg0: i32) -> (i32, i32) {
    %c0_i32 = arith.constant 0 : i32
    %c0_i32_0 = arith.constant 0 : i32
    %c0_i32_1 = arith.constant 0 : i32
    return %c0_i32, %c0_i32_0 : i32, i32
  }
  func.func @transform_4(%arg0: i32) -> (i32, i32) {
    %c0_i32 = arith.constant 0 : i32
    %c0_i32_0 = arith.constant 0 : i32
    %c0_i32_1 = arith.constant 0 : i32
    return %c0_i32, %c0_i32_0 : i32, i32
  }
  func.func @transform_5(%arg0: i32) -> (i32, i32) {
    %c0_i32 = arith.constant 0 : i32
    %c0_i32_0 = arith.constant 0 : i32
    return %c0_i32, %arg0 : i32, i32
  }
}

</mosaic_0001>

<bundles_post_ra>
// kernel: tpu_custom_call.1
= control target key start
LH: loop header
LB: loop body
LE: loop exit
PB: predicated region body
PF: predicated region fallthrough
CT: control target
= control target key end

     0   :  { %s403_s0 = inlined_call_operand.hbm [shape: bf16[12,128], index: 0, kind: input, shape index: {}]   ;;  %s404_s1 = inlined_call_operand.vmem [shape: f32[12,12], index: 1, kind: input, shape index: {}]   ;;  %s405_s2 = inlined_call_operand.vmem [shape: f32[12,1], index: 2, kind: input, shape index: {}]   ;;  %s406_s3 = inlined_call_operand.vmem [shape: f32[1,12], index: 3, kind: input, shape index: {}]   ;;  %s407_s4 = inlined_call_operand.<no memory space> [shape: f32[1,1], index: 4, kind: input, shape index: {}]   ;;  %s408_s5 = inlined_call_operand.hbm [shape: f32[1,128], index: 5, kind: output, shape index: {}]  }
   0x1   :  { %v10_v0 = vstv %s407_s4 }
   0x2   :  { %11 = vst [vmem:[#allocation2] sm:$0x1] %v10_v0 }
   0x3   :  { %12 = vsyncpa [#allocation4], 0 }
   0x4   :  { %13 = vsyncpa [#allocation5], 0  ;;  %s336_s20 = smov [#allocation3]  }
   0x5   :  { %s19_s21 = sshll.u32 %s336_s20, 4  ;;  %s20_s21 = int_to_ptr.vmem [resolvable:$true] %s19_s21 }
   0x6   :  { %s300_s22 = scalar_lea.vmem %s20_s21, 128  ;;  %p305_p1 = scmp.lt.s32.totalorder %s20_s21, %s20_s21 }
   0x7   :  { %p301_p0 = scmp.ne.s32.totalorder %s20_s21, %s300_s22  ;;  %p306_p2 = scmp.lt.s32.totalorder %s300_s22, %s300_s22 }
   0x9   :  { %p307_p3 = por %p306_p2, %p305_p1 }
   0xb   :  { %p308_p4 = pnand %p307_p3, %p301_p0 }
   0xd   :  { %311 = shalt.err (!%p308_p4)
}
   0xe   :  { %s337_s23 = smov 64   ;;  %s338_s24 = smov 4  }
   0xf   :  { %25 = dma.hbm_to_vmem [thread:$0]  %s403_s0, 128, %s20_s21, [#allocation4], %s337_s23, %s337_s23, %s338_s24  }
  0x10   :  { %332 = dma.done.wait [#allocation4], 128  }
  0x11   :  { %333 = vsyncadd [#allocation4], 4294967168  ;;  %v339_v1 = vmov 0   ;;  %vm55_vm0 = vcmask 97280   ;;  %v38_v2 = vld [vmem:[#allocation3 + $0x4] sm:$0x3]  ;;  %v150_v21 = vlaneseq }
  0x12   :  { %286 = vset.pattern.permute.xlu0 %v339_v1  ;;  %287 = vset.pattern.permute.xlu1 %v339_v1  ;;  %vm62_vm1 = vcmask 1043456   ;;  %v37_v3 = vld [vmem:[#allocation3] sm:$0xf]  ;;  %v40_v5 = vunpack.c.l.bf16 %v38_v2  ;;  %v44_v7 = vld [vmem:[%s405_s2 + $0x8] sm:$0xf]  ;;  %v340_v10 = vmov 0.0  }
  0x13   :  { %v41_v4 = vld [vmem:[%s404_s1] sm:$0xff]  ;;  %v39_v6 = vunpack.c.l.bf16 %v37_v3  ;;  %52 = vperm.xlu0 %286, %v44_v7   ;;  %v42_v9 = vld [vmem:[%s404_s1 + $0x8] sm:$0xf]  ;;  %272 = vmatprep.subr.mxu1 %v340_v10  ;;  %vm341_vm2 = vmmov 0   ;;  %v151_v22 = vshrl.u32 %v150_v21, 7  ;;  %s342_s8 = smov [#allocation6]  }
  0x14   :  { %269 = vmatprep.mubr.msk.f32.mxu0 %vm55_vm0, %v41_v4  ;;  %265 = vmatprep.subr.msk.mxu0 %vm62_vm1, %v40_v5  ;;  %v43_v8 = vld [vmem:[%s405_s2] sm:$0xff]  ;;  %s243_s9 = sshll.u32 %s342_s8, 4  ;;  %s244_s9 = int_to_ptr.vmem [resolvable:$true] %s243_s9 }
  0x15   :  { %266 = vmatpush3.msk.msra.mxu0 %vm62_vm1, %v40_v5  ;;  %276 = vmatprep.mubr.msk.f32.mxu1 %vm341_vm2, %v340_v10  ;;  %v144_v11 = vld [vmem:[#allocation2] sm:$0x1]  ;;  %v152_v23 = vsub.s32 0, %v151_v22  ;;  %s316_s10 = scalar_lea.vmem %s244_s9, 32  ;;  %p317_p6 = scmp.lt.s32.totalorder %s244_s9, %s244_s9 }
  0x16   :  { %267 = vmatprep.subr.mxu0 %v39_v6  ;;  %147 = vperm.xlu1 %287, %v144_v11   ;;  %v143_v20 = vld [vmem:[%s406_s3] sm:$0x1]  ;;  %s312_s3 = scalar_lea.vmem %s244_s9, 16 }
  0x17   :  { %268 = vmatpush3.msra.mxu0 %v39_v6  ;;  %47 = vperm.xlu0 %286, %v43_v8   ;;  %p313_p5 = scmp.ne.s32.totalorder %s244_s9, %s312_s3  ;;  %p318_p7 = scmp.lt.s32.totalorder %s316_s10, %s312_s3 }
  0x18   :  { %270 = vmatmul.mubr.msk.f32.vlgmr.msra.gmra.mxu0 %vm55_vm0, %v42_v9 }
  0x19   :  { %p319_p8 = por %p318_p7, %p317_p6 }
  0x1b   :  { %p320_p9 = pnand %p319_p8, %p313_p5 }
  0x8e   :  { %v53_v12 = vpop.permute.xlu0 %52 }
  0x91   :  { %v148_v24 = vpop.permute.xlu1 %147 }
  0x92   :  { %v48_v15 = vpop.permute.xlu0 %47  ;;  %v153_v25 = vrot.slane %v148_v24, %v152_v23 }
  0xd8   :  { %v271_v13 = vpop.f32.mrf.mxu0 }
  0xd9   :  { %v138_v14 = vadd.f32 %v271_v13, %v53_v12 }
  0xda   :  { %v132_v16 = vpop.f32.mrf.mxu0 }
  0xdb   :  { %v142_v17 = vmax.f32 %v138_v14, 0.0  ;;  %v133_v18 = vadd.f32 %v132_v16, %v48_v15 }
  0xdd   :  { %v141_v19 = vmax.f32 %v133_v18, 0.0  ;;  %273 = vmatpush3.msk.msra.mxu1 %vm62_vm1, %v142_v17 }
  0xde   :  { %274 = vmatprep.subr.mxu1 %v340_v10 }
  0xdf   :  { %275 = vmatpush3.msra.mxu1 %v141_v19 }
  0xe0   :  { %277 = vmatmul.mubr.msk.f32.vlgmr.msra.gmra.mxu1 %vm55_vm0, %v143_v20 }
 0x1a0   :  { %v226_v26 = vpop.f32.mrf.mxu1 }
 0x1a1   :  { %v227_v27 = vadd.f32 %v226_v26, %v153_v25 }
 0x1a2   :  { %v278_v28 = vpop.f32.mrf.mxu1 }
 0x1a3   :  { %v257_v29 = vmul.f32 -1.442695, %v227_v27 }
 0x1a5   :  { %288 = vpow2.f32 %v257_v29 }
 0x1b2   :  { %v289_v30 = vpop.eup %288 }
 0x1b3   :  { %v233_v31 = vadd.f32 1.0, %v289_v30 }
 0x1b5   :  { %290 = vrcp.f32 %v233_v31 }
 0x1c2   :  { %v291_v32 = vpop.eup %290 }
 0x1c3   :  { %236 = vst [vmem:[#allocation6] sm:$0x1] %v291_v32 }
 0x1c4   :  { %323 = shalt.err (!%p320_p9)
}
 0x1c5   :  { %246 = dma.vmem_to_hbm [thread:$0]  %s244_s9, 16, %s408_s5, [#allocation5]  }
 0x1c6   :  { %334 = dma.done.wait [#allocation5], 16  }
 0x1c7   :  { %335 = vsyncadd [#allocation5], 4294967280 }
 0x1c8   :  { %250 = vsyncpa [#allocation4], 1 }
 0x1c9   :  { %251 = vsyncpa [#allocation5], 1 }

</bundles_post_ra>
